<compile_context>
chip_gen: v6e
topology: v6e:2x2x1
jax: 0.10.0
libtpu: 0.0.40
codegen_flags: <defaults>
</compile_context>

<pallas_src>
import functools
import math

import jax
import jax.numpy as jnp
from jax import lax
from jax.experimental import pallas as pl
from jax.experimental.pallas import tpu as pltpu


_ROW_TILE_MAX = 256            # live (row_tile, 128) partial <= 32 f32 vregs
_LANE_TILE_MAX = 32768         # bounds the trace-time unrolled lane fold
_TILE_BYTES_BUDGET = 8 << 20   # per input block (double-buffered by pipeline)
_SMALL_BYTES = 1 << 20         # below this, plain XLA wins on fixed cost


def _identity_for_max(dtype):
    if jnp.issubdtype(dtype, jnp.floating):
        return float("-inf")
    if dtype == jnp.bool_:
        return False
    return int(jnp.iinfo(dtype).min)


def _round_up(v, m):
    return ((v + m - 1) // m) * m


def _legal_second_minor(t, full, sub):
    """Clamp a second-minor tile to a Mosaic-legal value (mult. of `sub` or == full)."""
    t = max(1, min(int(t), full))
    if t == full:
        return t
    t = _round_up(t, sub)
    return full if t >= full else t


def _vmem_capacity_bytes():
    try:
        info = pltpu.get_tpu_info()
        return int(getattr(info, "vmem_capacity_bytes", 64 << 20))
    except Exception:
        return 64 << 20


def _max_pool_kernel(x_ref, o_ref, *scratch, hw, lane_tile, num_k, fill,
                     first_masked_group):
    """x_ref: (row_tile, lane_tile); o_ref: (row_tile, 1);
    scratch: optional (row_tile, 128) VMEM accumulator (only when num_k > 1)."""
    k = pl.program_id(1)
    groups = lane_tile // 128
    rem = lane_tile % 128
    fill_v = jnp.array(fill, dtype=x_ref.dtype)

    if first_masked_group is not None:
        lane_iota = lax.broadcasted_iota(jnp.int32, (1, 128), 1)

    def load_group(g):
        # Slice the ref (zero-cost view) so only one 128-lane group is live at
        # a time -> minimal vreg pressure.
        xg = x_ref[:, g * 128:(g + 1) * 128]
        if first_masked_group is not None and g >= first_masked_group:
            # Only groups that can straddle/exceed `hw` in the last reduction
            # block pay for the select; earlier groups stream through as-is.
            valid = (lane_iota + (k * lane_tile + g * 128)) < hw
            xg = jnp.where(valid, xg, fill_v)
        return xg

    part = None
    if groups >= 1:
        # Pure-VPU vmax fold of 128-lane groups.
        part = load_group(0)
        for g in range(1, groups):
            part = jnp.maximum(part, load_group(g))

    if num_k == 1:
        # Single reduction step: no accumulator, no init, no RMW.
        if groups == 0:
            o_ref[...] = jnp.max(x_ref[...], axis=-1, keepdims=True)
        else:
            red = jnp.max(part, axis=-1, keepdims=True)
            if rem:
                tail = jnp.max(x_ref[:, groups * 128:groups * 128 + rem],
                               axis=-1, keepdims=True)
                red = jnp.maximum(red, tail)
            o_ref[...] = red
    else:
        # Multi-step reduction: lane-dense (row_tile, 128) VMEM accumulator.
        acc_ref = scratch[0]

        @pl.when(k == 0)
        def _():
            acc_ref[...] = part            # first partial: plain store, no fill

        @pl.when(k > 0)
        def _():
            acc_ref[...] = jnp.maximum(acc_ref[...], part)

        @pl.when(k == num_k - 1)
        def _():
            # One cross-lane (XLU) reduce per row block; output written once.
            o_ref[...] = jnp.max(acc_ref[...], axis=-1, keepdims=True)


def max_global_pool2d(x, *, row_tile=None, lane_tile=None, force_pallas=False):
    """Global max over the last two dims (== torch.amax(x, dim=(-2, -1)))."""
    assert x.ndim >= 3, x.shape
    lead_shape = x.shape[:-2]
    H, W = x.shape[-2], x.shape[-1]
    R = math.prod(lead_shape)
    HW = H * W
    dtype = x.dtype
    itemsize = jnp.dtype(dtype).itemsize

    # Degenerate shapes or tiny activations: XLA fuses the whole reduce and
    # wins on fixed cost (launch + pipeline setup + HBM round trip).
    if R == 0 or HW == 0 or (not force_pallas and R * HW * itemsize < _SMALL_BYTES):
        return jnp.max(x, axis=(-2, -1))

    fill = _identity_for_max(dtype)
    sub = {4: 8, 2: 16, 1: 32}.get(itemsize, 8)   # sublane multiple per dtype packing
    x2 = x.reshape(R, HW)

    # ---- tile selection ----------------------------------------------------
    # Row tile: aim for >= 2 row blocks (keeps both v7x TensorCores busy via
    # the "parallel" axis) while capping vreg pressure of the lane fold.
    if row_tile is None:
        row_tile = min(_ROW_TILE_MAX, pl.cdiv(R, 2))
    row_tile = _legal_second_minor(row_tile, R, sub)

    # Lane tile: full HW (single reduction step) when it fits the per-block
    # byte budget, else the largest multiple of 128 that does.
    vmem_cap = _vmem_capacity_bytes()
    tile_budget = max(512 << 10, min(_TILE_BYTES_BUDGET, vmem_cap // 8))
    if lane_tile is None:
        cap = tile_budget // max(1, row_tile * itemsize)
        cap = max(128, (cap // 128) * 128)
        cap = min(cap, _LANE_TILE_MAX)
        lane_tile = HW if HW <= cap else cap
    else:
        lane_tile = int(lane_tile)
        lane_tile = HW if lane_tile >= HW else max(128, (lane_tile // 128) * 128)
    lane_tile = min(lane_tile, HW)

    num_i = pl.cdiv(R, row_tile)
    num_k = pl.cdiv(HW, lane_tile)
    assert num_k == 1 or lane_tile % 128 == 0, (lane_tile, HW)

    hw_rem = HW % lane_tile
    first_masked_group = (hw_rem // 128) if (num_k > 1 and hw_rem != 0) else None

    scratch_shapes = []
    if num_k > 1:
        scratch_shapes.append(pltpu.VMEM((row_tile, 128), dtype))

    block_bytes = row_tile * lane_tile * itemsize
    vmem_limit = int(min(vmem_cap // 2, 2 * block_bytes + (8 << 20)))

    kernel = functools.partial(
        _max_pool_kernel,
        hw=HW, lane_tile=lane_tile, num_k=num_k, fill=fill,
        first_masked_group=first_masked_group)

    out = pl.pallas_call(
        kernel,
        out_shape=jax.ShapeDtypeStruct((R, 1), dtype),
        grid=(num_i, num_k),
        in_specs=[pl.BlockSpec((row_tile, lane_tile), lambda i, k: (i, k))],
        out_specs=pl.BlockSpec((row_tile, 1), lambda i, k: (i, 0)),
        scratch_shapes=tuple(scratch_shapes),
        compiler_params=pltpu.CompilerParams(
            dimension_semantics=("parallel", "arbitrary"),
            vmem_limit_bytes=vmem_limit),
        cost_estimate=pl.CostEstimate(
            flops=R * HW,
            transcendentals=0,
            bytes_accessed=R * HW * itemsize + R * itemsize),
    )(x2)

    return out.reshape(lead_shape)


if __name__ == "__main__":
    key = jax.random.PRNGKey(0)
    k1, k2, k3, k4 = jax.random.split(key, 4)

    # Spec shape: NCHW = (2, 4, 16, 16), f32.  Exercise the Pallas kernel
    # (single reduction step, 2 lane groups) and the small-input XLA fallback.
    x1 = jax.random.normal(k1, (2, 4, 16, 16), dtype=jnp.float32)
    ref1 = jnp.max(x1, axis=(-2, -1))
    y1 = max_global_pool2d(x1, force_pallas=True)
    y1_fb = max_global_pool2d(x1)                     # default: XLA fallback
    assert y1.shape == ref1.shape == (2, 4), (y1.shape, ref1.shape)
    assert y1.dtype == x1.dtype
    assert jnp.array_equal(y1, ref1), "mismatch (case 1: pallas)"
    assert jnp.array_equal(y1_fb, ref1), "mismatch (case 1: fallback)"

    # Odd, non-(8,128)-aligned dims; HW < 128 (full-block, no lane groups).
    x2 = jax.random.normal(k2, (2, 3, 9, 13), dtype=jnp.float32)
    y2 = max_global_pool2d(x2, force_pallas=True)
    assert jnp.array_equal(y2, jnp.max(x2, axis=(-2, -1))), "mismatch (case 2)"

    # Multi-step reduction: 2x3 grid, VMEM accumulator, ragged row block and
    # ragged (masked) lane block.
    x3 = jax.random.normal(k3, (3, 5, 10, 30), dtype=jnp.float32)
    y3 = max_global_pool2d(x3, row_tile=8, lane_tile=128, force_pallas=True)
    assert jnp.array_equal(y3, jnp.max(x3, axis=(-2, -1))), "mismatch (case 3)"

    # bf16 coverage (native-dtype reduction, no upcast).
    x4 = jax.random.normal(k1, (2, 4, 16, 16), dtype=jnp.bfloat16)
    y4 = max_global_pool2d(x4, force_pallas=True)
    assert y4.dtype == jnp.bfloat16
    assert jnp.array_equal(y4, jnp.max(x4, axis=(-2, -1))), "mismatch (case 4)"

    # Big enough (2 MiB) to take the Pallas path by default (2 row blocks).
    x5 = jax.random.normal(k4, (8, 16, 64, 64), dtype=jnp.float32)
    y5 = max_global_pool2d(x5)
    assert jnp.array_equal(y5, jnp.max(x5, axis=(-2, -1))), "mismatch (case 5)"

    jax.block_until_ready((y1, y1_fb, y2, y3, y4, y5))
    print("KERNEL_OK")
</pallas_src>

<mosaic_0001>
module attributes {stable_mosaic.version = 11 : i64} {
  func.func @_max_pool_kernel(%arg0: i32, %arg1: i32, %arg2: memref<8x256xf32, #tpu.memory_space<vmem>>, %arg3: memref<8x1xf32, #tpu.memory_space<vmem>>) attributes {dimension_semantics = [#tpu.dimension_semantics<parallel>, #tpu.dimension_semantics<arbitrary>], iteration_bounds = array<i64: 1, 1>, scalar_prefetch = 0 : i64, scratch_operands = 0 : i64, tpu.core_type = #tpu.core_type<tc>, window_params = [{transform_indices = @transform_0, window_bounds = array<i64: 8, 256>}, {transform_indices = @transform_1, window_bounds = array<i64: 8, 1>}]} {
    %c0 = arith.constant 0 : index
    %c0_0 = arith.constant 0 : index
    %0 = vector.load %arg2[%c0, %c0_0] : memref<8x256xf32, #tpu.memory_space<vmem>>, vector<8x128xf32>
    %c0_1 = arith.constant 0 : index
    %c128 = arith.constant 128 : index
    %1 = vector.load %arg2[%c0_1, %c128] : memref<8x256xf32, #tpu.memory_space<vmem>>, vector<8x128xf32>
    %2 = arith.maximumf %0, %1 : vector<8x128xf32>
    %cst = arith.constant dense<0xFF800000> : vector<8xf32>
    %3 = vector.multi_reduction <maximumf>, %2, %cst [1] : vector<8x128xf32> to vector<8xf32>
    %4 = vector.shape_cast %3 : vector<8xf32> to vector<8x1xf32>
    %c0_2 = arith.constant 0 : index
    %c0_3 = arith.constant 0 : index
    %5 = vector.load %arg3[%c0_2, %c0_3] : memref<8x1xf32, #tpu.memory_space<vmem>>, vector<8x1xf32>
    tpu.vector_store %arg3[%c0_2, %c0_3], %4 {strides = array<i32>} : memref<8x1xf32, #tpu.memory_space<vmem>>, vector<8x1xf32>,
    return
  }
  func.func @transform_0(%arg0: i32, %arg1: i32) -> (i32, i32) {
    %c0_i32 = arith.constant 0 : i32
    return %arg0, %arg1 : i32, i32
  }
  func.func @transform_1(%arg0: i32, %arg1: i32) -> (i32, i32) {
    %c0_i32 = arith.constant 0 : i32
    %c0_i32_0 = arith.constant 0 : i32
    return %arg0, %c0_i32 : i32, i32
  }
}

</mosaic_0001>

<bundles_post_ra>
// kernel: tpu_custom_call.1
= control target key start
LH: loop header
LB: loop body
LE: loop exit
PB: predicated region body
PF: predicated region fallthrough
CT: control target
= control target key end

     0   :  { %6 = vsyncpa [#allocation3], 0  ;;  %s55_s6 = smov [#allocation2]   ;;  %s72_s0 = inlined_call_operand.hbm [shape: f32[8,256], index: 0, kind: input, shape index: {}]   ;;  %s73_s1 = inlined_call_operand.vmem [shape: f32[8,1], index: 1, kind: output, shape index: {}]  }
   0x1   :  { %s13_s7 = sshll.u32 %s55_s6, 4  ;;  %s14_s7 = int_to_ptr.vmem [resolvable:$true] %s13_s7 }
   0x2   :  { %s41_s8 = scalar_lea.vmem %s14_s7, 256  ;;  %p46_p1 = scmp.lt.s32.totalorder %s14_s7, %s14_s7 }
   0x3   :  { %p42_p0 = scmp.ne.s32.totalorder %s14_s7, %s41_s8  ;;  %p47_p2 = scmp.lt.s32.totalorder %s41_s8, %s41_s8 }
   0x5   :  { %p48_p3 = por %p47_p2, %p46_p1 }
   0x7   :  { %p49_p4 = pnand %p48_p3, %p42_p0 }
   0x9   :  { %52 = shalt.err (!%p49_p4)
}
   0xa   :  { %16 = dma.hbm_to_vmem [thread:$0]  %s72_s0, 256, %s14_s7, [#allocation3]  }
   0xb   :  { %53 = dma.done.wait [#allocation3], 256  }
   0xc   :  { %54 = vsyncadd [#allocation3], 4294967040  ;;  %v20_v0 = vld [vmem:[#allocation2] sm:$0xff]  ;;  %v21_v1 = vld [vmem:[#allocation2 + $0x8] sm:$0xff]  ;;  %vm25_vm0 = vcmask 7168  }
   0xd   :  { %v22_v2 = vmax.f32 %v20_v0, %v21_v1 }
   0xf   :  { %23 = vmax.xlane.f32.xlu0 %v22_v2 }
  0x98   :  { %v24_v3 = vpop.xlane.xlu0 %23 }
  0x99   :  { %26 = vst.msk [vmem:[%s73_s1] sm:$0xff] %vm25_vm0, %v24_v3 }
  0x9a   :  { %31 = vsyncpa [#allocation3], 1 }

</bundles_post_ra>
